<compile_context>
chip_gen: v7x
topology: tpu7x:2x2x1
jax: 0.10.0
libtpu: 0.0.40
codegen_flags: <defaults>
</compile_context>

<pallas_src>
import jax
import jax.numpy as jnp
from jax.experimental import pallas as pl
from jax.experimental.pallas import tpu as pltpu


def _swish_kernel(x_ref, o_ref):
    # f32 internal math: the kernel is memory-bound on every generation, so the
    # VPU/EUP work is hidden under the DMA and the upcast costs nothing.
    x = x_ref[...].astype(jnp.float32)
    o_ref[...] = (x * jax.nn.sigmoid(x)).astype(o_ref.dtype)


def _tile_config():
    """(target_block_bytes, vmem_limit_bytes), derived from the chip's VMEM size."""
    vmem_bytes = 0
    try:
        info = pltpu.get_tpu_info()
        vmem_bytes = int(getattr(info, "vmem_capacity_bytes", 0) or 0)
    except Exception:
        vmem_bytes = 0
    if vmem_bytes >= 100 * 1024 * 1024:
        # v5e / v6e: 128 MiB physical VMEM -> 8 MiB tiles, 64 MiB scoped limit.
        return 8 * 1024 * 1024, 64 * 1024 * 1024
    # v7x (64 MiB physical) or unknown: stay conservative.
    return 4 * 1024 * 1024, 40 * 1024 * 1024


def _pick_lanes(n, cap=4096):
    """Largest multiple-of-128 divisor of n, capped at `cap`. Requires n % 128 == 0."""
    c = min(cap, n)
    c -= c % 128
    while c >= 128:
        if n % c == 0:
            return c
        c -= 128
    return 128


def _swish_slab(x_flat, *, inplace=False):
    """Run the kernel on a flat array whose size is a multiple of 128."""
    n = x_flat.size
    dtype = x_flat.dtype
    itemsize = jnp.dtype(dtype).itemsize
    sublane = max(8, 32 // itemsize)  # 8 f32, 16 bf16/f16, 32 for 1-byte dtypes

    lanes = _pick_lanes(n)
    rows = n // lanes
    x2d = x_flat.reshape(rows, lanes)

    target_block_bytes, vmem_limit = _tile_config()
    block_rows = max(1, target_block_bytes // (lanes * itemsize))
    if block_rows >= rows:
        if rows > sublane:
            # Whole slab fits one block: split into >=4 grid steps so the
            # double-buffer pipeline overlaps DMA/compute and both v7x TCs get work.
            block_rows = pl.cdiv(pl.cdiv(rows, 4), sublane) * sublane
        else:
            block_rows = rows  # full-extent block (legal even when rows < sublane)
    else:
        block_rows = max(sublane, (block_rows // sublane) * sublane)

    grid = (pl.cdiv(rows, block_rows),)

    extra = {}
    if inplace:
        extra["input_output_aliases"] = {0: 0}

    out2d = pl.pallas_call(
        _swish_kernel,
        out_shape=jax.ShapeDtypeStruct((rows, lanes), dtype),
        grid_spec=pltpu.PrefetchScalarGridSpec(
            num_scalar_prefetch=0,
            grid=grid,
            in_specs=[pl.BlockSpec((block_rows, lanes), lambda i: (i, 0))],
            out_specs=pl.BlockSpec((block_rows, lanes), lambda i: (i, 0)),
        ),
        compiler_params=pltpu.CompilerParams(
            dimension_semantics=("parallel",),
            vmem_limit_bytes=vmem_limit,
        ),
        **extra,
    )(x2d)
    return out2d.reshape(-1)


def swish1(x, *, inplace=False):
    """Elementwise swish: sigmoid(x) * x (same semantics as the PyTorch Swish1)."""
    if not jnp.issubdtype(x.dtype, jnp.floating):
        # Match PyTorch: nn.Sigmoid rejects integer tensors.
        raise TypeError(f"swish1 requires a floating dtype, got {x.dtype}")

    orig_shape = x.shape
    dtype = x.dtype
    n = x.size
    if n == 0:
        return x

    x_flat = jnp.ravel(x)

    if n % 128 == 0:
        out_flat = _swish_slab(x_flat, inplace=inplace)
    else:
        # Ragged total size: kernel on the multiple-of-128 prefix, plain jnp on the
        # tiny (<128 element) tail — avoids the pad + slice full-array round trips.
        n_main = (n // 128) * 128
        tail = x_flat[n_main:]
        tail_f32 = tail.astype(jnp.float32)
        tail_out = (tail_f32 * jax.nn.sigmoid(tail_f32)).astype(dtype)
        if n_main == 0:
            out_flat = tail_out
        else:
            main_out = _swish_slab(x_flat[:n_main])
            out_flat = jnp.concatenate([main_out, tail_out])

    return out_flat.reshape(orig_shape)


if __name__ == "__main__":
    key = jax.random.PRNGKey(0)

    # NCHW input, as a PyTorch conv activation would be.
    x = jax.random.normal(key, (2, 4, 16, 16), dtype=jnp.float32)
    y = jax.block_until_ready(swish1(x))
    y_ref = x * jax.nn.sigmoid(x)
    assert y.shape == x.shape and y.dtype == x.dtype
    assert jnp.allclose(y, y_ref, atol=1e-6, rtol=1e-6)

    # Ragged-size path (n % 128 != 0): prefix through the kernel, tail in jnp.
    x_rag = jax.random.normal(jax.random.PRNGKey(1), (3, 50), dtype=jnp.float32)
    y_rag = jax.block_until_ready(swish1(x_rag))
    y_rag_ref = x_rag * jax.nn.sigmoid(x_rag)
    assert y_rag.shape == x_rag.shape and y_rag.dtype == x_rag.dtype
    assert jnp.allclose(y_rag, y_rag_ref, atol=1e-6, rtol=1e-6)

    print("KERNEL_OK")
</pallas_src>

<mosaic_0001>
module attributes {stable_mosaic.version = 11 : i64} {
  func.func @_swish_kernel(%arg0: i32, %arg1: memref<1x2048xf32, #tpu.memory_space<vmem>>, %arg2: memref<1x2048xf32, #tpu.memory_space<vmem>>) attributes {dimension_semantics = [#tpu.dimension_semantics<parallel>], iteration_bounds = array<i64: 1>, scalar_prefetch = 0 : i64, scratch_operands = 0 : i64, tpu.core_type = #tpu.core_type<tc>, window_params = [{transform_indices = @transform_0, window_bounds = array<i64: 1, 2048>}, {transform_indices = @transform_1, window_bounds = array<i64: 1, 2048>}]} {
    %c0 = arith.constant 0 : index
    %c0_0 = arith.constant 0 : index
    %0 = vector.load %arg1[%c0, %c0_0] : memref<1x2048xf32, #tpu.memory_space<vmem>>, vector<1x2048xf32>
    %1 = arith.negf %0 : vector<1x2048xf32>
    %2 = math.exp %1 : vector<1x2048xf32>
    %cst = arith.constant 1.000000e+00 : f32
    %3 = vector.broadcast %cst : f32 to vector<1x2048xf32>
    %4 = arith.addf %3, %2 : vector<1x2048xf32>
    %5 = arith.divf %3, %4 : vector<1x2048xf32>
    %6 = arith.mulf %0, %5 : vector<1x2048xf32>
    %c0_1 = arith.constant 0 : index
    %c0_2 = arith.constant 0 : index
    %7 = vector.load %arg2[%c0_1, %c0_2] : memref<1x2048xf32, #tpu.memory_space<vmem>>, vector<1x2048xf32>
    tpu.vector_store %arg2[%c0_1, %c0_2], %6 {strides = array<i32>} : memref<1x2048xf32, #tpu.memory_space<vmem>>, vector<1x2048xf32>,
    return
  }
  func.func @transform_0(%arg0: i32) -> (i32, i32) {
    %c0_i32 = arith.constant 0 : i32
    %c0_i32_0 = arith.constant 0 : i32
    return %arg0, %c0_i32 : i32, i32
  }
  func.func @transform_1(%arg0: i32) -> (i32, i32) {
    %c0_i32 = arith.constant 0 : i32
    %c0_i32_0 = arith.constant 0 : i32
    return %arg0, %c0_i32 : i32, i32
  }
}

</mosaic_0001>

<bundles_post_ra>
// kernel: tpu_custom_call.1
= control target key start
LH: loop header
LB: loop body
LE: loop exit
PB: predicated region body
PF: predicated region fallthrough
CT: control target
= control target key end

     0   :  { %6 = vsyncpa [#allocation3], 0  ;;  %s150_s0 = inlined_call_operand.hbm [shape: f32[1,2048], index: 0, kind: input, shape index: {}]   ;;  %s151_s1 = inlined_call_operand.hbm [shape: f32[1,2048], index: 1, kind: output, shape index: {}]  }
   0x1   :  { %7 = vsyncpa [#allocation4], 0  ;;  %s114_s6 = smov [#allocation2]   ;;  %s66_s10 = scalar_lea.hbm %s150_s0, 256 }
   0x2   :  { %s14_s7 = sshll.u32 %s114_s6, 4  ;;  %p67_p0 = scmp.ne.s32.totalorder %s150_s0, %s66_s10  ;;  %s15_s7 = int_to_ptr.vmem [resolvable:$true] %s14_s7 }
   0x3   :  { %p70_p1 = scmp.lt.u32.totalorder %s66_s10, %s150_s0 }
   0x5   :  { %p72_p2 = pnand %p70_p1, %p67_p0 }
   0x7   :  { %75 = shalt.err (!%p72_p2)
}
   0x8   :  { %s76_s15 = scalar_lea.vmem %s15_s7, 256  ;;  %p81_p4 = scmp.lt.s32.totalorder %s15_s7, %s15_s7 }
   0x9   :  { %p77_p3 = scmp.ne.s32.totalorder %s15_s7, %s76_s15  ;;  %p82_p5 = scmp.lt.s32.totalorder %s76_s15, %s76_s15 }
   0xb   :  { %p83_p6 = por %p82_p5, %p81_p4 }
   0xd   :  { %p84_p7 = pnand %p83_p6, %p77_p3 }
   0xf   :  { %87 = shalt.err (!%p84_p7)
}
  0x10   :  { %17 = dma.hbm_to_vmem [thread:$0]  %s150_s0, 256, %s15_s7, [#allocation3]  }
  0x11   :  { %110 = dma.done.wait [#allocation3], 256  }
  0x12   :  { %111 = vsyncadd [#allocation3], 4294967040  ;;  %v21_v0 = vld [vmem:[#allocation2] sm:$0xff]  ;;  %v22_v1 = vld [vmem:[#allocation2 + $0x8] sm:$0xff]  ;;  %s115_s18 = smov [#allocation5]  }
  0x13   :  { %v54_v2 = vmul.f32 -1.442695, %v21_v0  ;;  %v55_v3 = vmul.f32 -1.442695, %v22_v1  ;;  %s45_s19 = sshll.u32 %s115_s18, 4  ;;  %s46_s19 = int_to_ptr.vmem [resolvable:$true] %s45_s19 }
  0x14   :  { %s88_s0 = scalar_lea.vmem %s46_s19, 256  ;;  %p93_p9 = scmp.lt.s32.totalorder %s46_s19, %s46_s19 }
  0x15   :  { %58 = vpow2.f32 %v54_v2  ;;  %p89_p8 = scmp.ne.s32.totalorder %s46_s19, %s88_s0  ;;  %p94_p10 = scmp.lt.s32.totalorder %s88_s0, %s88_s0 }
  0x16   :  { %60 = vpow2.f32 %v55_v3 }
  0x17   :  { %p95_p11 = por %p94_p10, %p93_p9 }
  0x19   :  { %p96_p12 = pnand %p95_p11, %p89_p8 }
  0x1f   :  { %v59_v4 = vpop.eup %58 }
  0x20   :  { %v61_v5 = vpop.eup %60  ;;  %v29_v6 = vadd.f32 1.0, %v59_v4 }
  0x21   :  { %v30_v7 = vadd.f32 1.0, %v61_v5 }
  0x22   :  { %62 = vrcp.f32 %v29_v6 }
  0x23   :  { %64 = vrcp.f32 %v30_v7 }
  0x2c   :  { %v63_v8 = vpop.eup %62 }
  0x2d   :  { %v65_v9 = vpop.eup %64  ;;  %v35_v10 = vmul.f32 %v63_v8, %v21_v0 }
  0x2e   :  { %v36_v11 = vmul.f32 %v65_v9, %v22_v1 }
  0x2f   :  { %37 = vst [vmem:[#allocation5] sm:$0xff] %v35_v10 }
  0x30   :  { %38 = vst [vmem:[#allocation5 + $0x8] sm:$0xff] %v36_v11 }
  0x31   :  { %99 = shalt.err (!%p96_p12)
}
  0x32   :  { %s100_s22 = scalar_lea.hbm %s151_s1, 256 }
  0x33   :  { %p101_p13 = scmp.ne.s32.totalorder %s151_s1, %s100_s22  ;;  %p104_p0 = scmp.lt.u32.totalorder %s100_s22, %s151_s1 }
  0x35   :  { %p106_p1 = pnand %p104_p0, %p101_p13 }
  0x37   :  { %109 = shalt.err (!%p106_p1)
}
  0x38   :  { %48 = dma.vmem_to_hbm [thread:$0]  %s46_s19, 256, %s151_s1, [#allocation4]  }
  0x39   :  { %112 = dma.done.wait [#allocation4], 256  }
  0x3a   :  { %113 = vsyncadd [#allocation4], 4294967040 }
  0x3b   :  { %52 = vsyncpa [#allocation3], 1 }
  0x3c   :  { %53 = vsyncpa [#allocation4], 1 }

</bundles_post_ra>
